<compile_context>
chip_gen: v6e
topology: v6e:2x2x1
jax: 0.10.0
libtpu: 0.0.40
codegen_flags: <defaults>
</compile_context>

<pallas_src>
import functools

import jax
import jax.numpy as jnp
from jax.experimental import pallas as pl
from jax.experimental.pallas import tpu as pltpu


def _make_mlp_kernel(num_hidden_layers: int, use_sigmoid_out: bool):
    """Fused feature-major MLP forward: activations kept as (features, block_m)."""

    def kernel(*refs):
        x_ref = refs[0]            # (input_dim, block_m), compute dtype (bf16 by default)
        o_ref = refs[-1]           # (1, block_m), float32
        param_refs = refs[1:-1]    # interleaved (w0, b0, w1, b1, ...); w: (out, in), b: (out, 1)

        h = x_ref[...]                                   # stays in compute dtype for the MXU
        n_layers = num_hidden_layers + 1                 # hidden layers + final projection to 1
        for i in range(n_layers):
            w = param_refs[2 * i][...]                   # (out, in)   compute dtype
            b = param_refs[2 * i + 1][...]               # (out, 1)    float32
            # Feature-major matmul: (out, in) @ (in, block_m) -> (out, block_m), f32 accumulation.
            h = jnp.dot(w, h, preferred_element_type=jnp.float32) + b
            if i < num_hidden_layers:
                h = jnp.maximum(h, 0.0).astype(w.dtype)  # ReLU, back to compute dtype for next MXU pass
            elif use_sigmoid_out:
                h = jax.nn.sigmoid(h)                    # final (1, block_m) logits -> probs (EUP)
        o_ref[...] = h.astype(o_ref.dtype)

    return kernel


def _choose_block_m(batch: int) -> int:
    """Pick a lane-dense batch tile.

    - multiple of 128 so the lane axis is full and output stores are unmasked,
    - large enough to amortize per-grid-step pipeline overhead (~600 cycles),
    - >= 2 grid steps when possible so v7x's two TensorCores both run,
    - capped at 2048 rows to stay comfortably inside v5e's 16 MiB scoped VMEM.
    """
    if batch % 128 != 0:
        return batch               # tiny/odd batch: single full-extent tile
    for cand in (2048, 1024, 512, 256, 128):
        if batch % cand == 0 and batch // cand >= 2:
            return cand
    return batch                   # batch itself is a small multiple of 128: one tile


def init_params(key, input_dim, hidden_units_list):
    """Deterministic init matching nn.Linear: W (out, in), b (out, 1), U(+-1/sqrt(fan_in))."""
    dims = [input_dim] + list(hidden_units_list) + [1]
    params = []
    for i in range(len(dims) - 1):
        fan_in, fan_out = dims[i], dims[i + 1]
        key, kw, kb = jax.random.split(key, 3)
        bound = 1.0 / jnp.sqrt(jnp.float32(fan_in))
        w = jax.random.uniform(kw, (fan_out, fan_in), jnp.float32, -bound, bound)
        b = jax.random.uniform(kb, (fan_out, 1), jnp.float32, -bound, bound)
        params.append((w, b))
    return params


@functools.partial(jax.jit, static_argnames=("use_sigmoid_out", "block_m", "compute_dtype"))
def torch_model_forward(x, params, use_sigmoid_out=True, block_m=None,
                        compute_dtype=jnp.bfloat16):
    """Pallas TPU implementation of TorchModel.forward.

    x:      (batch, input_dim) float32
    params: list of (W: (out, in), b: (out, 1)) pairs; last pair projects to 1.
    returns (batch, 1) float32
    """
    batch, input_dim = x.shape
    num_hidden_layers = len(params) - 1
    if block_m is None:
        block_m = _choose_block_m(batch)
    assert batch % block_m == 0, "batch must be divisible by block_m"
    assert block_m == batch or block_m % 128 == 0, "block_m must be lane-aligned or the full batch"

    # Feature-major input: lane axis = batch. Transpose + bf16 cast fuse into a
    # single XLA pass at the pallas_call boundary.
    x_t = x.astype(compute_dtype).T                      # (input_dim, batch)

    kernel = _make_mlp_kernel(num_hidden_layers, use_sigmoid_out)

    # Weights/biases use constant index_maps -> resident in VMEM across all
    # grid steps (total < 20 KiB), so the grid loop is pure x-streaming.
    flat_params = []
    in_specs = [pl.BlockSpec((input_dim, block_m), lambda i: (0, i))]
    for (w, b) in params:
        w_c = w.astype(compute_dtype)
        b_c = b.astype(jnp.float32)
        flat_params.extend([w_c, b_c])
        in_specs.append(pl.BlockSpec(w_c.shape, lambda i: (0, 0)))
        in_specs.append(pl.BlockSpec(b_c.shape, lambda i: (0, 0)))

    out_spec = pl.BlockSpec((1, block_m), lambda i: (0, i))

    y_t = pl.pallas_call(
        kernel,
        out_shape=jax.ShapeDtypeStruct((1, batch), jnp.float32),
        grid_spec=pltpu.PrefetchScalarGridSpec(
            num_scalar_prefetch=0,
            grid=(batch // block_m,),
            in_specs=in_specs,
            out_specs=out_spec,
        ),
        compiler_params=pltpu.CompilerParams(
            dimension_semantics=("parallel",),   # batch tiles shard across v7x's 2 TensorCores
        ),
    )(x_t, *flat_params)

    return y_t.T                                          # (batch, 1)


def reference_forward(x, params, use_sigmoid_out=True):
    """Pure-JAX f32 reference (PyTorch convention: y = x @ W.T + b)."""
    h = x
    n_layers = len(params)
    for i, (w, b) in enumerate(params):
        h = h @ w.T + b.T
        if i < n_layers - 1:
            h = jnp.maximum(h, 0.0)
        elif use_sigmoid_out:
            h = jax.nn.sigmoid(h)
    return h


if __name__ == "__main__":
    key = jax.random.PRNGKey(0)
    batch = 256            # small, but enough for 2 lane-dense (128-row) parallel grid steps
    input_dim = 32
    hidden_units_list = [64, 32]
    use_sigmoid_out = True

    key, kx, kp = jax.random.split(key, 3)
    x = jax.random.normal(kx, (batch, input_dim), jnp.float32)
    params = init_params(kp, input_dim, hidden_units_list)

    out = torch_model_forward(x, params, use_sigmoid_out=use_sigmoid_out)
    out = jax.block_until_ready(out)

    ref = reference_forward(x, params, use_sigmoid_out=use_sigmoid_out)
    assert out.shape == (batch, 1), out.shape
    # bf16 compute path -> looser tolerance than the pure-f32 version.
    assert jnp.allclose(out, ref, atol=2e-2, rtol=2e-2), "mismatch vs reference"

    print("KERNEL_OK")
</pallas_src>

<mosaic_0001>
module attributes {stable_mosaic.version = 11 : i64} {
  func.func @kernel(%arg0: i32, %arg1: memref<32x128xbf16, #tpu.memory_space<vmem>>, %arg2: memref<64x32xbf16, #tpu.memory_space<vmem>>, %arg3: memref<64x1xf32, #tpu.memory_space<vmem>>, %arg4: memref<32x64xbf16, #tpu.memory_space<vmem>>, %arg5: memref<32x1xf32, #tpu.memory_space<vmem>>, %arg6: memref<1x32xbf16, #tpu.memory_space<vmem>>, %arg7: memref<1x1xf32, #tpu.memory_space<vmem>>, %arg8: memref<1x128xf32, #tpu.memory_space<vmem>>) attributes {dimension_semantics = [#tpu.dimension_semantics<parallel>], iteration_bounds = array<i64: 2>, scalar_prefetch = 0 : i64, scratch_operands = 0 : i64, tpu.core_type = #tpu.core_type<tc>, window_params = [{transform_indices = @transform_0, window_bounds = array<i64: 32, 128>}, {pipeline_mode = #tpu.pipeline_mode<synchronous>, transform_indices = @transform_1, window_bounds = array<i64: 64, 32>}, {pipeline_mode = #tpu.pipeline_mode<synchronous>, transform_indices = @transform_2, window_bounds = array<i64: 64, 1>}, {pipeline_mode = #tpu.pipeline_mode<synchronous>, transform_indices = @transform_3, window_bounds = array<i64: 32, 64>}, {pipeline_mode = #tpu.pipeline_mode<synchronous>, transform_indices = @transform_4, window_bounds = array<i64: 32, 1>}, {pipeline_mode = #tpu.pipeline_mode<synchronous>, transform_indices = @transform_5, window_bounds = array<i64: 1, 32>}, {pipeline_mode = #tpu.pipeline_mode<synchronous>, transform_indices = @transform_6, window_bounds = array<i64: 1, 1>}, {transform_indices = @transform_7, window_bounds = array<i64: 1, 128>}]} {
    %c0 = arith.constant 0 : index
    %c0_0 = arith.constant 0 : index
    %0 = vector.load %arg1[%c0, %c0_0] : memref<32x128xbf16, #tpu.memory_space<vmem>>, vector<32x128xbf16>
    %c0_1 = arith.constant 0 : index
    %c0_2 = arith.constant 0 : index
    %1 = vector.load %arg2[%c0_1, %c0_2] : memref<64x32xbf16, #tpu.memory_space<vmem>>, vector<64x32xbf16>
    %c0_3 = arith.constant 0 : index
    %c0_4 = arith.constant 0 : index
    %2 = vector.load %arg3[%c0_3, %c0_4] : memref<64x1xf32, #tpu.memory_space<vmem>>, vector<64x1xf32>
    %cst = arith.constant dense<0.000000e+00> : vector<64x128xf32>
    %3 = tpu.matmul %1, %0, %cst {dimension_numbers = #tpu.dot_dimension_numbers<[1], [0], [0], [1], [0, 0, 1, 1], [], []>} : vector<64x32xbf16>, vector<32x128xbf16>, vector<64x128xf32> -> vector<64x128xf32>
    %4 = vector.broadcast %2 : vector<64x1xf32> to vector<64x128xf32>
    %5 = arith.addf %3, %4 : vector<64x128xf32>
    %cst_5 = arith.constant 0.000000e+00 : f32
    %6 = vector.broadcast %cst_5 : f32 to vector<64x128xf32>
    %7 = arith.maximumf %5, %6 : vector<64x128xf32>
    %8 = arith.truncf %7 : vector<64x128xf32> to vector<64x128xbf16>
    %c0_6 = arith.constant 0 : index
    %c0_7 = arith.constant 0 : index
    %9 = vector.load %arg4[%c0_6, %c0_7] : memref<32x64xbf16, #tpu.memory_space<vmem>>, vector<32x64xbf16>
    %c0_8 = arith.constant 0 : index
    %c0_9 = arith.constant 0 : index
    %10 = vector.load %arg5[%c0_8, %c0_9] : memref<32x1xf32, #tpu.memory_space<vmem>>, vector<32x1xf32>
    %cst_10 = arith.constant dense<0.000000e+00> : vector<32x128xf32>
    %11 = tpu.matmul %9, %8, %cst_10 {dimension_numbers = #tpu.dot_dimension_numbers<[1], [0], [0], [1], [0, 0, 1, 1], [], []>} : vector<32x64xbf16>, vector<64x128xbf16>, vector<32x128xf32> -> vector<32x128xf32>
    %12 = vector.broadcast %10 : vector<32x1xf32> to vector<32x128xf32>
    %13 = arith.addf %11, %12 : vector<32x128xf32>
    %cst_11 = arith.constant 0.000000e+00 : f32
    %14 = vector.broadcast %cst_11 : f32 to vector<32x128xf32>
    %15 = arith.maximumf %13, %14 : vector<32x128xf32>
    %16 = arith.truncf %15 : vector<32x128xf32> to vector<32x128xbf16>
    %c0_12 = arith.constant 0 : index
    %c0_13 = arith.constant 0 : index
    %17 = vector.load %arg6[%c0_12, %c0_13] : memref<1x32xbf16, #tpu.memory_space<vmem>>, vector<1x32xbf16>
    %c0_14 = arith.constant 0 : index
    %c0_15 = arith.constant 0 : index
    %18 = vector.load %arg7[%c0_14, %c0_15] : memref<1x1xf32, #tpu.memory_space<vmem>>, vector<1x1xf32>
    %cst_16 = arith.constant dense<0.000000e+00> : vector<1x128xf32>
    %19 = tpu.matmul %17, %16, %cst_16 {dimension_numbers = #tpu.dot_dimension_numbers<[1], [0], [0], [1], [0, 0, 1, 1], [], []>} : vector<1x32xbf16>, vector<32x128xbf16>, vector<1x128xf32> -> vector<1x128xf32>
    %20 = vector.broadcast %18 : vector<1x1xf32> to vector<1x128xf32>
    %21 = arith.addf %19, %20 : vector<1x128xf32>
    %22 = arith.negf %21 : vector<1x128xf32>
    %23 = math.exp %22 : vector<1x128xf32>
    %cst_17 = arith.constant 1.000000e+00 : f32
    %24 = vector.broadcast %cst_17 : f32 to vector<1x128xf32>
    %25 = arith.addf %24, %23 : vector<1x128xf32>
    %26 = arith.divf %24, %25 : vector<1x128xf32>
    %c0_18 = arith.constant 0 : index
    %c0_19 = arith.constant 0 : index
    %27 = vector.load %arg8[%c0_18, %c0_19] : memref<1x128xf32, #tpu.memory_space<vmem>>, vector<1x128xf32>
    tpu.vector_store %arg8[%c0_18, %c0_19], %26 {strides = array<i32>} : memref<1x128xf32, #tpu.memory_space<vmem>>, vector<1x128xf32>,
    return
  }
  func.func @transform_0(%arg0: i32) -> (i32, i32) {
    %c0_i32 = arith.constant 0 : i32
    %c0_i32_0 = arith.constant 0 : i32
    return %c0_i32, %arg0 : i32, i32
  }
  func.func @transform_1(%arg0: i32) -> (i32, i32) {
    %c0_i32 = arith.constant 0 : i32
    %c0_i32_0 = arith.constant 0 : i32
    %c0_i32_1 = arith.constant 0 : i32
    return %c0_i32, %c0_i32_0 : i32, i32
  }
  func.func @transform_2(%arg0: i32) -> (i32, i32) {
    %c0_i32 = arith.constant 0 : i32
    %c0_i32_0 = arith.constant 0 : i32
    %c0_i32_1 = arith.constant 0 : i32
    return %c0_i32, %c0_i32_0 : i32, i32
  }
  func.func @transform_3(%arg0: i32) -> (i32, i32) {
    %c0_i32 = arith.constant 0 : i32
    %c0_i32_0 = arith.constant 0 : i32
    %c0_i32_1 = arith.constant 0 : i32
    return %c0_i32, %c0_i32_0 : i32, i32
  }
  func.func @transform_4(%arg0: i32) -> (i32, i32) {
    %c0_i32 = arith.constant 0 : i32
    %c0_i32_0 = arith.constant 0 : i32
    %c0_i32_1 = arith.constant 0 : i32
    return %c0_i32, %c0_i32_0 : i32, i32
  }
  func.func @transform_5(%arg0: i32) -> (i32, i32) {
    %c0_i32 = arith.constant 0 : i32
    %c0_i32_0 = arith.constant 0 : i32
    %c0_i32_1 = arith.constant 0 : i32
    return %c0_i32, %c0_i32_0 : i32, i32
  }
  func.func @transform_6(%arg0: i32) -> (i32, i32) {
    %c0_i32 = arith.constant 0 : i32
    %c0_i32_0 = arith.constant 0 : i32
    %c0_i32_1 = arith.constant 0 : i32
    return %c0_i32, %c0_i32_0 : i32, i32
  }
  func.func @transform_7(%arg0: i32) -> (i32, i32) {
    %c0_i32 = arith.constant 0 : i32
    %c0_i32_0 = arith.constant 0 : i32
    return %c0_i32, %arg0 : i32, i32
  }
}

</mosaic_0001>

<bundles_post_ra>
// kernel: torch_model_forward.1
= control target key start
LH: loop header
LB: loop body
LE: loop exit
PB: predicated region body
PF: predicated region fallthrough
CT: control target
= control target key end

     0   :  { %s1156_s0 = inlined_call_operand.vmem [shape: bf16[32,256], index: 0, kind: input, shape index: {}]   ;;  %s1157_s1 = inlined_call_operand.vmem [shape: bf16[64,32], index: 1, kind: input, shape index: {}]   ;;  %s1158_s2 = inlined_call_operand.vmem [shape: f32[64,1], index: 2, kind: input, shape index: {}]   ;;  %s1159_s3 = inlined_call_operand.vmem [shape: bf16[32,64], index: 3, kind: input, shape index: {}]   ;;  %s1160_s4 = inlined_call_operand.vmem [shape: f32[32,1], index: 4, kind: input, shape index: {}]   ;;  %s1161_s5 = inlined_call_operand.vmem [shape: bf16[1,32], index: 5, kind: input, shape index: {}]   ;;  %s1162_s6 = inlined_call_operand.<no memory space> [shape: f32[1,1], index: 6, kind: input, shape index: {}]   ;;  %s1163_s7 = inlined_call_operand.hbm [shape: f32[1,256], index: 7, kind: output, shape index: {}]  }
   0x1   :  { %v12_v0 = vstv %s1162_s6 }
   0x2   :  { %13 = vst [vmem:[#allocation2] sm:$0x1] %v12_v0 }
   0x3   :  { %14 = vsyncpa [#allocation5], 0 }
   0x4   :  { %16 = vsyncpa [#allocation5 + $0x1], 0  ;;  %s989_s26 = smov 0   ;;  %s991_s27 = smov 0  }
   0x5   :  { %s993_s28 = smov 0   ;;  %s995_s29 = smov 0  }
   0x6 LB: > { %s750_s6 = sadd.s32 4294967295, %s940_s29   ;;  %s751_s30 = sadd.s32 4294967294, %s940_s29   ;;  %s940_s29 = sphi %s995_s29, %s1169_s29   ;;  %s936_s28 = sphi %s993_s28, %s1168_s28   ;;  %s932_s27 = sphi %s991_s27, %s1167_s27   ;;  %s928_s26 = sphi %s989_s26, %s1166_s26  }
   0x7   : > { %s1012_s8 = sadd.s32 1, %s940_s29   ;;  %s29_s9 = sadd.s32 1, %s936_s28 }
   0x8   : > { %s26_s10 = ssub.s32 %s940_s29, %s1012_s8  ;;  %p36_p0 = scmp.ne.s32.totalorder %s936_s28, %s932_s27 }
   0x9   : > { %p27_p1 = scmp.eq.s32.totalorder %s26_s10, 0  ;;  %p37_p2 = scmp.eq.s32.totalorder %s940_s29, 0 }
   0xa   : > { %p192_p3 = scmp.eq.s32.totalorder %s750_s6, 1  ;;  %p197_p4 = scmp.ne.s32.totalorder %s932_s27, %s928_s26 }
   0xb   : > { %s1025_s11 = scalar_select %p27_p1, %s936_s28, %s29_s9  }
   0xc   : > { %p38_p5 = por %p37_p2, %p36_p0  ;;  %p1027_p6 = por %p192_p3, %p36_p0 }
   0xd   : > { %p198_p7 = scmp.eq.s32.totalorder %s751_s30, 1  ;;  %p753_p9 = scmp.ge.s32.totalorder %s940_s29, 2 }
   0xf   : > { %p1031_p8 = por %p198_p7, %p197_p4  ;;  %232 = sbr.rel (%p753_p9) target bundleno = 26 (0x1a), region = 40 }
  0x14   : > { %235 = sbr.rel (!%p38_p5) target bundleno = 26 (0x1a), region = 44  ;;  %s237_s14 = sand.u32 (%p38_p5), 1, %s936_s28  }
  0x15   : > { %s755_s15 = sshll.u32 (%p38_p5), %s940_s29, 2  ;;  %s754_s16 = sshll.u32 (%p38_p5), %s237_s14, 4 }
  0x16   : > { %s241_s19 = scalar_lea.vmem (%p38_p5), %s1156_s0, %s755_s15  ;;  %s239_s20 = scalar_lea.vmem (%p38_p5), [#allocation3], %s754_s16 }
  0x17   : > { %v258_v1 = vld [vmem:[%s241_s19] sm:$0xf] (%p38_p5)  ;;  %v260_v2 = vld [vmem:[%s241_s19 + $0x8] sm:$0xf] (%p38_p5)  ;;  %v262_v3 = vld [vmem:[%s241_s19 + $0x10] sm:$0xf] (%p38_p5) }
  0x18   : > { %259 = vst [vmem:[%s239_s20] sm:$0xf] (%p38_p5), %v258_v1  ;;  %261 = vst [vmem:[%s239_s20 + $0x4] sm:$0xf] (%p38_p5), %v260_v2  ;;  %v264_v4 = vld [vmem:[%s241_s19 + $0x18] sm:$0xf] (%p38_p5) }
  0x19   : > { %263 = vst [vmem:[%s239_s20 + $0x8] sm:$0xf] %v262_v3  ;;  %265 = vst [vmem:[%s239_s20 + $0xc] sm:$0xf] %v264_v4 }
  0x1a PF: > { %p756_p10 = scmp.ge.s32.totalorder %s940_s29, 1  ;;  %p296_p11 = scmp.lt.s32.totalorder %s940_s29, 3 }
  0x1c   : > { %p297_p12 = pnand %p756_p10, %p296_p11 }
  0x1d   : > { %s1046_s21 = sand.u32 (!%p297_p12), 1, %s932_s27   ;;  %s774_s19 = sshll.u32 (!%p297_p12), %s750_s6, 4 }
  0x1e   : > { %300 = sbr.rel (%p297_p12) target bundleno = 722 (0x2d2), region = 85  ;;  %s757_s24 = sshll.u32 (!%p297_p12), %s1046_s21, 4 }
  0x1f   : > { %s305_s25 = scalar_lea.vmem (!%p297_p12), [#allocation3], %s757_s24  ;;  %s332_s20 = scalar_lea.vmem (!%p297_p12), [#allocation4], %s1046_s21 }
  0x20   : > { %s690_s22 = sshll.u32 (!%p297_p12), %s332_s20, 4  ;;  %s678_s30 = scalar_lea.sflag (!%p297_p12), [#allocation5], %s1046_s21  ;;  %s691_s22 = int_to_ptr.vmem [resolvable:$true] %s690_s22 }
  0x21   : > { %s880_s9 = scalar_lea.vmem (!%p297_p12), %s691_s22, 16  ;;  %s945_s10 = smov (!%p297_p12), [#allocation4]  }
  0x22   : > { %p881_p13 = scmp.ne.s32.totalorder (!%p297_p12), %s691_s22, %s880_s9  ;;  %s884_s14 = sshll.u32 (!%p297_p12), %s945_s10, 4  ;;  %s885_s14 = int_to_ptr.vmem [resolvable:$false] %s884_s14 }
  0x23   : > { %v870_v5 = vld [vmem:[%s1157_s1] sm:$0xff]   ;;  %vm426_vm0 = vcmask 261120   ;;  %v942_v8 = vmov 0   ;;  %v352_v9 = vld [vmem:[%s1158_s2 + $0x30] sm:$0xff]  ;;  %v353_v11 = vld [vmem:[%s1158_s2 + $0x38] sm:$0xff]  ;;  %vm554_vm1 = vcmask 523264   ;;  %p887_p2 = scmp.lt.s32.totalorder %s691_s22, %s885_s14 }
  0x24   : > { %796 = vmatprep.mubr.msk.bf16.mxu0 %vm426_vm0, %v870_v5  ;;  %v868_v6 = vld [vmem:[%s305_s25 + $0x8] sm:$0xff]   ;;  %v869_v7 = vld [vmem:[%s305_s25] sm:$0xff]   ;;  %866 = vset.pattern.permute.xlu0 %v942_v8  ;;  %v943_v63 = vmov 0.0   ;;  %vm944_vm2 = vmmov 0   ;;  %s1119_s25 = scalar_lea.hbm %s1163_s7, %s774_s19  ;;  %p882_p0 = pnand %p881_p13, %p1027_p6 }
  0x25   : > { %867 = vset.pattern.permute.xlu1 %v942_v8  ;;  %792 = vmatprep.subr.bf16.mxu0 %v868_v6  ;;  %v350_v10 = vld [vmem:[%s1158_s2 + $0x20] sm:$0xff]  ;;  %v871_v12 = vld [vmem:[%s1157_s1 + $0x8] sm:$0xff]   ;;  %v872_v14 = vld [vmem:[%s1157_s1 + $0x10] sm:$0xff]   ;;  %s886_s6 = scalar_lea.vmem %s885_s14, 32 }
  0x26   : > { %793 = vmatpush3.bf16.msra.mxu0 %v868_v6  ;;  %386 = vperm.xlu0 %866, %v352_v9   ;;  %v351_v13 = vld [vmem:[%s1158_s2 + $0x28] sm:$0xff]  ;;  %v348_v15 = vld [vmem:[%s1158_s2 + $0x10] sm:$0xff]  ;;  %v349_v16 = vld [vmem:[%s1158_s2 + $0x18] sm:$0xff]  ;;  %p883_p1 = pneg %p882_p0  ;;  %p888_p3 = scmp.lt.s32.totalorder %s886_s6, %s880_s9 }
  0x27   : > { %794 = vmatprep.subr.bf16.mxu0 %v869_v7  ;;  %376 = vperm.xlu1 %867, %v350_v10   ;;  %v346_v17 = vld [vmem:[%s1158_s2] sm:$0xff]  ;;  %v873_v18 = vld [vmem:[%s1157_s1 + $0x18] sm:$0xff]   ;;  %v347_v19 = vld [vmem:[%s1158_s2 + $0x8] sm:$0xff] }
  0x28   : > { %v522_v20 = vld [vmem:[%s1160_s4 + $0x10] sm:$0xff]  ;;  %v523_v21 = vld [vmem:[%s1160_s4 + $0x18] sm:$0xff]  ;;  %v520_v22 = vld [vmem:[%s1160_s4] sm:$0xff]  ;;  %p889_p4 = por %p888_p3, %p887_p2 }
  0x29   : > { %v521_v23 = vld [vmem:[%s1160_s4 + $0x8] sm:$0xff]  ;;  %v617_v24 = vld [vmem:[#allocation2] sm:$0x1] }
  0x2a   : > { %795 = vmatpush3.bf16.msra.mxu0 %v869_v7  ;;  %391 = vperm.xlu0 %866, %v353_v11   ;;  %v874_v25 = vld [vmem:[%s1159_s3] sm:$0xff]   ;;  %v875_v62 = vld [vmem:[%s1159_s3 + $0x8] sm:$0xff]   ;;  %p890_p5 = pnand %p889_p4, %p883_p1 }
  0x2b   : > { %381 = vperm.xlu1 %867, %v351_v13   ;;  %812 = vmatprep.mubr.msk.bf16.mxu1 %vm554_vm1, %v874_v25 }
  0x2c   : > { %816 = vmatprep.subr.bf16.mxu0 %v943_v63 }
  0x2d   : > { %797 = vmatmul.mubr.msk.bf16.vlgmr.msra.gmra.mxu0 %vm426_vm0, %v871_v12 }
  0x2e   : > { %800 = vmatprep.mubr.msk.bf16.mxu0 %vm426_vm0, %v872_v14  ;;  %366 = vperm.xlu0 %866, %v348_v15  }
  0x2f   : > { %371 = vperm.xlu1 %867, %v349_v16  }
  0x32   : > { %356 = vperm.xlu0 %866, %v346_v17  }
  0x33   : > { %361 = vperm.xlu1 %867, %v347_v19   ;;  %v623_v19 = vlaneseq }
  0x35   : > { %801 = vmatmul.mubr.msk.bf16.gmra.mxu0 %vm426_vm0, %v873_v18  ;;  %v616_v18 = vld [vmem:[%s1161_s5] sm:$0x1] }
  0x36   : > { %536 = vperm.xlu0 %866, %v522_v20   ;;  %820 = vmatprep.mubr.msk.bf16.mxu0 %vm944_vm2, %v943_v63  ;;  %v624_v20 = vshrl.u32 %v623_v19, 7 }
  0x37   : > { %541 = vperm.xlu1 %867, %v523_v21  }
  0x38   : > { %v625_v21 = vsub.s32 0, %v624_v20 }
  0x3a   : > { %526 = vperm.xlu0 %866, %v520_v22  }
  0x3b   : > { %531 = vperm.xlu1 %867, %v521_v23  }
  0x3e   : > { %620 = vperm.xlu0 %866, %v617_v24  }
  0xa1   : > { %v387_v28 = vpop.permute.xlu0 %386 }
  0xa2   : > { %v377_v26 = vpop.permute.xlu1 %376 }
  0xa5   : > { %v392_v33 = vpop.permute.xlu0 %391 }
  0xa6   : > { %v382_v31 = vpop.permute.xlu1 %381 }
  0xa9   : > { %v367_v41 = vpop.permute.xlu0 %366 }
  0xaa   : > { %v372_v37 = vpop.permute.xlu1 %371 }
  0xad   : > { %v357_v55 = vpop.permute.xlu0 %356 }
  0xae   : > { %v362_v51 = vpop.permute.xlu1 %361 }
  0xb1   : > { %v537_v0 = vpop.permute.xlu0 %536 }
  0xb2   : > { %v542_v1 = vpop.permute.xlu1 %541 }
  0xb5   : > { %v527_v6 = vpop.permute.xlu0 %526 }
  0xb6   : > { %v532_v8 = vpop.permute.xlu1 %531 }
  0xb9   : > { %v621_v22 = vpop.permute.xlu0 %620 }
  0xba   : > { %v626_v23 = vrot.slane %v621_v22, %v625_v21 }
  0xed   : > { %v798_v27 = vpop.f32.mrf.mxu0 }
  0xee   : > { %v482_v47 = vadd.f32 %v798_v27, %v367_v41 }
  0xef   : > { %v473_v29 = vpop.f32.mrf.mxu0 }
  0xf0   : > { %v506_v56 = vmax.f32 %v482_v47, 0.0  ;;  %v474_v57 = vadd.f32 %v473_v29, %v357_v55 }
  0xf1   : > { %v799_v30 = vpop.f32.mrf.mxu0 }
  0xf2   : > { %v485_v43 = vadd.f32 %v799_v30, %v372_v37  ;;  %v504_v60 = vmax.f32 %v474_v57, 0.0 }
  0xf3   : > { %v476_v32 = vpop.f32.mrf.mxu0 }
  0xf4   : > { %v507_v52 = vmax.f32 %v485_v43, 0.0  ;;  %v477_v53 = vadd.f32 %v476_v32, %v362_v51 }
  0xf5   : > { %v802_v34 = vpop.f32.mrf.mxu0 }
  0xf6   : > { %v498_v36 = vadd.f32 %v802_v34, %v387_v28  ;;  %v513_v58 = vpack.c.bf16 %v507_v52, %v506_v56  ;;  %v505_v59 = vmax.f32 %v477_v53, 0.0 }
  0xf7   : > { %v489_v35 = vpop.f32.mrf.mxu0 }
  0xf8   : > { %v490_v39 = vadd.f32 %v489_v35, %v377_v26  ;;  %v510_v44 = vmax.f32 %v498_v36, 0.0  ;;  %v512_v61 = vpack.c.bf16 %v505_v59, %v504_v60 }
  0xf9   : > { %v803_v38 = vpop.f32.mrf.mxu0 }
  0xfa   : > { %v501_v40 = vadd.f32 %v803_v38, %v392_v33  ;;  %v508_v48 = vmax.f32 %v490_v39, 0.0 }
  0xfb   : > { %v492_v42 = vpop.f32.mrf.mxu0 }
  0xfc   : > { %v511_v45 = vmax.f32 %v501_v40, 0.0  ;;  %v493_v46 = vadd.f32 %v492_v42, %v382_v31 }
  0xfe   : > { %v509_v49 = vmax.f32 %v493_v46, 0.0  ;;  %v515_v50 = vpack.c.bf16 %v511_v45, %v510_v44 }
 0x100   : > { %v514_v54 = vpack.c.bf16 %v509_v49, %v508_v48  ;;  %804 = vmatprep.subr.bf16.mxu1 %v515_v50 }
 0x101   : > { %805 = vmatpush3.bf16.msra.mxu1 %v515_v50 }
 0x102   : > { %806 = vmatprep.subr.bf16.mxu1 %v514_v54 }
 0x105   : > { %807 = vmatpush3.bf16.msra.mxu1 %v514_v54 }
 0x106   : > { %808 = vmatprep.subr.bf16.mxu1 %v513_v58 }
 0x109   : > { %809 = vmatpush3.bf16.msra.mxu1 %v513_v58 }
 0x10a   : > { %810 = vmatprep.subr.bf16.mxu1 %v512_v61 }
 0x10d   : > { %811 = vmatpush3.bf16.msra.mxu1 %v512_v61 }
 0x110   : > { %813 = vmatmul.mubr.msk.bf16.vlgmr.msra.gmra.mxu1 %vm554_vm1, %v875_v62 }
 0x1d0   : > { %v814_v2 = vpop.f32.mrf.mxu1 }
 0x1d1   : > { %v604_v4 = vadd.f32 %v814_v2, %v537_v0 }
 0x1d2   : > { %v595_v3 = vpop.f32.mrf.mxu1 }
 0x1d3   : > { %v612_v10 = vmax.f32 %v604_v4, 0.0  ;;  %v596_v11 = vadd.f32 %v595_v3, %v527_v6 }
 0x1d4   : > { %v815_v5 = vpop.f32.mrf.mxu1 }
 0x1d5   : > { %v607_v7 = vadd.f32 %v815_v5, %v542_v1  ;;  %v610_v16 = vmax.f32 %v596_v11, 0.0 }
 0x1d6   : > { %v598_v9 = vpop.f32.mrf.mxu1 }
 0x1d7   : > { %v613_v12 = vmax.f32 %v607_v7, 0.0  ;;  %v599_v13 = vadd.f32 %v598_v9, %v532_v8 }
 0x1d9   : > { %v615_v14 = vpack.c.bf16 %v613_v12, %v612_v10  ;;  %v611_v15 = vmax.f32 %v599_v13, 0.0 }
 0x1db   : > { %817 = vmatpush3.bf16.msra.mxu0 %v615_v14  ;;  %v614_v17 = vpack.c.bf16 %v611_v15, %v610_v16 }
 0x1dc   : > { %818 = vmatprep.subr.bf16.mxu0 %v943_v63 }
 0x1df   : > { %819 = vmatpush3.bf16.msra.mxu0 %v614_v17 }
 0x1e2   : > { %821 = vmatmul.mubr.msk.bf16.vlgmr.msra.gmra.mxu0 %vm426_vm0, %v616_v18 }
 0x2a2   : > { %v664_v24 = vpop.f32.mrf.mxu0 }
 0x2a3   : > { %v665_v25 = vadd.f32 %v664_v24, %v626_v23 }
 0x2a4   : > { %v822_v26 = vpop.f32.mrf.mxu0 }
 0x2a5   : > { %v773_v27 = vmul.f32 -1.442695, %v665_v25 }
 0x2a6   : > { %v667_v28 = vpop.f32.mrf.mxu0 }
 0x2a7   : > { %876 = vpow2.f32 %v773_v27 }
 0x2a8   : > { %v823_v29 = vpop.f32.mrf.mxu0 }
 0x2b4   : > { %v877_v30 = vpop.eup %876 }
 0x2b5   : > { %v673_v31 = vadd.f32 1.0, %v877_v30 }
 0x2b7   : > { %878 = vrcp.f32 %v673_v31 }
 0x2c4   : > { %v879_v32 = vpop.eup %878 }
 0x2c5   : > { %676 = vst [vmem:[%s332_s20] sm:$0x1] %v879_v32 }
 0x2c6   : > { %893 = shalt.err (!%p890_p5)
}
 0x2c7   : > { %s894_s15 = scalar_lea.hbm %s1119_s25, 16  ;;  %s898_s17 = scalar_lea.hbm %s1163_s7, 32 }
 0x2c8   : > { %p895_p7 = scmp.ne.s32.totalorder %s1119_s25, %s894_s15  ;;  %p899_p12 = scmp.lt.s32.totalorder %s1119_s25, %s1163_s7 }
 0x2c9   : > { %p900_p13 = scmp.lt.s32.totalorder %s898_s17, %s894_s15 }
 0x2ca   : > { %p896_p10 = pnand %p895_p7, %p1027_p6 }
 0x2cb   : > { %p901_p0 = por %p900_p13, %p899_p12 }
 0x2cc   : > { %p897_p11 = pneg %p896_p10 }
 0x2ce   : > { %p902_p1 = pnand %p901_p0, %p897_p11 }
 0x2d0   : > { %905 = shalt.err (!%p902_p1)
}
 0x2d1   : > { %824 = dma.vmem_to_hbm [thread:$0]  (%p1027_p6), %s691_s22, 16, %s1119_s25, %s678_s30  }
 0x2d2 PF: > { %s702_s20 = sand.u32 1, %s928_s26   ;;  %p827_p2 = pnand %p753_p9, %p1031_p8 }
 0x2d3   : > { %s703_s23 = scalar_lea.sflag [#allocation5], %s702_s20 }
 0x2d4   : > { %p828_p3 = pneg %p827_p2 }
 0x2d6   : > { %923 = dma.done.wait (%p828_p3), %s703_s23, 16  }
 0x2d7   : > { %925 = vsyncadd (%p828_p3), %s703_s23, 4294967280  ;;  %p19_p4 = scmp.ge.s32.totalorder %s1012_s8, 4   ;;  %s1166_s26 = smov %s932_s27 }
 0x2d8   : > { %s1167_s27 = smov %s936_s28  ;;  %s1168_s28 = smov %s1025_s11 }
 0x2d9   : > { %s1169_s29 = smov %s1012_s8  ;;  %21 = sbr.rel (!%p19_p4) target bundleno = 6 (0x6), region = 129 }
 0x2de   :  { %707 = vsyncpa [#allocation5], 1 }
 0x2df   :  { %709 = vsyncpa [#allocation5 + $0x1], 1 }

</bundles_post_ra>
